<compile_context>
chip_gen: v5e
topology: v5e:2x2
jax: 0.10.0
libtpu: 0.0.40
codegen_flags: <defaults>
</compile_context>

<pallas_src>
import jax
import jax.numpy as jnp
from jax.experimental import pallas as pl
from jax.experimental.pallas import tpu as pltpu

_TARGET_TILE_BYTES = 2 * 1024 * 1024    # ~2 MiB/block: 4x (in+out, 2-deep) = 8 MiB,
                                        # safe on v5e/v6e/v7x scoped-VMEM defaults.
_SMALL_BYPASS_BYTES = 1 * 1024 * 1024   # below this, pallas_call overhead dominates.
_LANE_CANDIDATES = (4096, 2048, 1024, 512, 256, 128)


def _copy_kernel(x_ref, o_ref):
    # Lane-dense identity copy; the flatten itself was already done for free
    # in the wrapper via jnp.reshape.
    o_ref[...] = x_ref[...]


def _sublane_multiple(dtype):
    """Sublane alignment so stores stay whole-vreg / unmasked."""
    itemsize = jnp.dtype(dtype).itemsize
    if itemsize >= 4:
        return 8
    if itemsize == 2:
        return 16
    return 32


def _pick_lane_width(total, sub):
    """Largest lane width (multiple of 128) dividing total, preferring one
    that still leaves >= `sub` rows (full sublane groups)."""
    best_any = None
    for lane in _LANE_CANDIDATES:
        if total % lane == 0:
            if best_any is None:
                best_any = lane
            if (total // lane) >= sub:
                return lane
    return best_any


def _pick_row_tile(rows, lane, itemsize, sub):
    """Largest sublane-aligned row tile dividing `rows` within the VMEM budget."""
    cap = max(sub, _TARGET_TILE_BYTES // (lane * itemsize))
    cap = (cap // sub) * sub
    t = cap
    while t >= sub:
        if rows % t == 0:
            return t
        t -= sub
    # No aligned divisor (or rows < one sublane group): a single full-dim
    # block is legal iff it fits the budget; otherwise give up on the kernel.
    if rows * lane * itemsize <= _TARGET_TILE_BYTES:
        return rows
    return None


def flatten_pallas(x, start_dim=1, *, force_kernel=False):
    """Pallas equivalent of torch.flatten(x, start_dim)."""
    ndim = x.ndim
    if start_dim < 0:
        start_dim += ndim

    lead = x.shape[:start_dim]
    flat = 1
    for d in x.shape[start_dim:]:
        flat *= d
    out_shape = lead + (flat,)

    total = 1
    for d in x.shape:
        total *= d
    itemsize = jnp.dtype(x.dtype).itemsize
    total_bytes = total * itemsize

    # Flatten is a pure metadata reshape: jnp.reshape is bit-exact and free.
    # Only route through the Pallas identity copy when a materialized copy /
    # fusion anchor is wanted and the array is big enough for the copy to run
    # near the HBM roofline (otherwise the kernel is pure overhead).
    if total == 0 or (not force_kernel and total_bytes < _SMALL_BYPASS_BYTES):
        return jnp.reshape(x, out_shape)

    sub = _sublane_multiple(x.dtype)
    lane = _pick_lane_width(total, sub)
    if lane is None:
        # Awkward (prime-ish) element count: never risk masked stores or a
        # VMEM blowup — the metadata reshape is already the exact answer.
        return jnp.reshape(x, out_shape)
    rows = total // lane

    tile_r = _pick_row_tile(rows, lane, itemsize, sub)
    if tile_r is None:
        return jnp.reshape(x, out_shape)

    grid = (rows // tile_r,)

    # Re-chunk the contiguous 1D stream wrapper-side: each (tile_r, lane)
    # block is one contiguous tile_r*lane*itemsize stretch of HBM.
    x2 = jnp.reshape(x, (rows, lane))

    y2 = pl.pallas_call(
        _copy_kernel,
        out_shape=jax.ShapeDtypeStruct((rows, lane), x.dtype),
        grid_spec=pltpu.PrefetchScalarGridSpec(
            num_scalar_prefetch=0,
            grid=grid,
            in_specs=[pl.BlockSpec((tile_r, lane), lambda i: (i, 0))],
            out_specs=pl.BlockSpec((tile_r, lane), lambda i: (i, 0)),
        ),
        compiler_params=pltpu.CompilerParams(
            dimension_semantics=("parallel",),   # lets v7x's 2 TCs split rows
            vmem_limit_bytes=32 * 1024 * 1024,   # headroom; < 64 MiB v7x physical
        ),
        cost_estimate=pl.CostEstimate(
            flops=0, transcendentals=0, bytes_accessed=2 * total_bytes),
    )(x2)

    return jnp.reshape(y2, out_shape)


if __name__ == "__main__":
    key = jax.random.PRNGKey(0)
    B, C, H, W = 2, 4, 16, 16
    x = jax.random.normal(key, (B, C, H, W), dtype=jnp.float32)

    # Reference: plain JAX reshape == torch.flatten(x, 1) element ordering.
    y_ref = jnp.reshape(x, (B, C * H * W))

    # Default path: tiny input -> free metadata reshape (no kernel overhead).
    y_fast = flatten_pallas(x, start_dim=1)
    jax.block_until_ready(y_fast)
    assert y_fast.shape == (B, C * H * W), y_fast.shape
    assert y_fast.dtype == x.dtype
    assert bool(jnp.array_equal(y_fast, y_ref)), "default path mismatch"

    # Forced-kernel path: exercise the Pallas identity-copy fusion anchor.
    y_kernel = flatten_pallas(x, start_dim=1, force_kernel=True)
    jax.block_until_ready(y_kernel)
    assert y_kernel.shape == (B, C * H * W), y_kernel.shape
    assert y_kernel.dtype == x.dtype
    assert bool(jnp.array_equal(y_kernel, y_ref)), "kernel path mismatch"

    print("KERNEL_OK")
</pallas_src>

<mosaic_0001>
module attributes {stable_mosaic.version = 11 : i64} {
  func.func @_copy_kernel(%arg0: i32, %arg1: memref<8x256xf32, #tpu.memory_space<vmem>>, %arg2: memref<8x256xf32, #tpu.memory_space<vmem>>) attributes {dimension_semantics = [#tpu.dimension_semantics<parallel>], iteration_bounds = array<i64: 1>, scalar_prefetch = 0 : i64, scratch_operands = 0 : i64, tpu.core_type = #tpu.core_type<tc>, window_params = [{transform_indices = @transform_0, window_bounds = array<i64: 8, 256>}, {transform_indices = @transform_1, window_bounds = array<i64: 8, 256>}]} {
    %c0 = arith.constant 0 : index
    %c0_0 = arith.constant 0 : index
    %0 = vector.load %arg1[%c0, %c0_0] : memref<8x256xf32, #tpu.memory_space<vmem>>, vector<8x256xf32>
    %c0_1 = arith.constant 0 : index
    %c0_2 = arith.constant 0 : index
    %1 = vector.load %arg2[%c0_1, %c0_2] : memref<8x256xf32, #tpu.memory_space<vmem>>, vector<8x256xf32>
    tpu.vector_store %arg2[%c0_1, %c0_2], %0 {strides = array<i32>} : memref<8x256xf32, #tpu.memory_space<vmem>>, vector<8x256xf32>,
    return
  }
  func.func @transform_0(%arg0: i32) -> (i32, i32) {
    %c0_i32 = arith.constant 0 : i32
    %c0_i32_0 = arith.constant 0 : i32
    return %arg0, %c0_i32 : i32, i32
  }
  func.func @transform_1(%arg0: i32) -> (i32, i32) {
    %c0_i32 = arith.constant 0 : i32
    %c0_i32_0 = arith.constant 0 : i32
    return %arg0, %c0_i32 : i32, i32
  }
}

</mosaic_0001>

<bundles_post_ra>
// kernel: tpu_custom_call.1
= control target key start
LH: loop header
LB: loop body
LE: loop exit
PB: predicated region body
PF: predicated region fallthrough
CT: control target
= control target key end

     0   :  { %6 = vsyncpa [#allocation3], 0  ;;  %s116_s0 = inlined_call_operand.hbm [shape: f32[8,256], index: 0, kind: input, shape index: {}]   ;;  %s117_s1 = inlined_call_operand.hbm [shape: f32[8,256], index: 1, kind: output, shape index: {}]  }
   0x1   :  { %7 = vsyncpa [#allocation4], 0  ;;  %s13_s8 = sshll.u32 %s116_s0, 4  ;;  %s98_s9 = smov [#allocation2]   ;;  %s14_s8 = int_to_ptr.hbm [resolvable:$true] %s13_s8 }
   0x2   :  { %s15_s10 = sshll.u32 %s98_s9, 4  ;;  %s16_s10 = int_to_ptr.vmem [resolvable:$true] %s15_s10 }
   0x3   :  { %18 = dma.hbm_to_vmem [thread:$0]  %s14_s8, 256, %s16_s10, [#allocation3]  }
   0x4   :  { %94 = dma.done.wait [#allocation3], 256  }
   0x5   :  { %95 = vsyncadd [#allocation3], 4294967040  ;;  %s99_s11 = smov [#allocation5]   ;;  %s34_s15 = sshll.u32 %s117_s1, 4  ;;  %v23_v0 = vld [vmem:[#allocation2] sm:$0xff]  ;;  %v24_v1 = vld [vmem:[#allocation2 + $0x8] sm:$0xff]  ;;  %s35_s15 = int_to_ptr.hbm [resolvable:$true] %s34_s15 }
   0x6   :  { %s32_s12 = sshll.u32 %s99_s11, 4  ;;  %25 = vst [vmem:[#allocation5] sm:$0xff] %v23_v0  ;;  %s33_s12 = int_to_ptr.vmem [resolvable:$true] %s32_s12 }
   0x7   :  { %26 = vst [vmem:[#allocation5 + $0x8] sm:$0xff] %v24_v1 }
   0x8   :  { %37 = dma.vmem_to_hbm [thread:$0]  %s33_s12, 256, %s35_s15, [#allocation4]  }
   0x9   :  { %96 = dma.done.wait [#allocation4], 256  }
   0xa   :  { %97 = vsyncadd [#allocation4], 4294967040 }
   0xb   :  { %42 = vsyncpa [#allocation3], 1 }
   0xc   :  { %43 = vsyncpa [#allocation4], 1 }

</bundles_post_ra>
